<compile_context>
chip_gen: v7x
topology: tpu7x:2x2x1
jax: 0.10.0
libtpu: 0.0.40
codegen_flags: <defaults>
</compile_context>

<pallas_src>
import jax
import jax.numpy as jnp
from jax import lax
from jax.experimental import pallas as pl
from jax.experimental.pallas import tpu as pltpu


# op name -> kernel spatial size (stride 1, 'same' padding, bias=True).  The OPS registry
# is not part of the reference module, so we use a deterministic 2-op search space
# consistent with the OPS[op](c_in, c_out, 1, True) call convention.
OPS = {"conv_3x3": (3, 3), "conv_1x1": (1, 1)}

_CENTER_TAP = 4  # tap index (dy=0, dx=0) in the 3x3 tap grid


def _avg_pool_3x3_s2_nchw(x):
    # TODO(synk): AvgPool2d((3,3), stride=2) branch stays in plain JAX
    # (lax.reduce_window); it is not exercised at 16x16 spatial (img_size <= 50).
    s = lax.reduce_window(x, 0.0, lax.add,
                          window_dimensions=(1, 1, 3, 3),
                          window_strides=(1, 1, 2, 2),
                          padding="VALID")
    return s / 9.0


def _build_cell_kernel(groups, depth, W, L):
    """Fused whole-cell kernel body (closure over the static DAG description).

    groups: per-source-node fused work units (metadata only), source ascending.
    """
    groups_by_src = {g["src"]: g for g in groups}

    def kernel(x_ref, mask_ref, w_ref, o_ref):
        masks = mask_ref[...]                          # (9, L)  loaded once per step
        ones_row = jnp.ones((1, L), jnp.float32)       # bias column of the im2col stack
        # Intermediate node activations stay in registers/values (they are tiny); the
        # only HBM traffic is the input block, the packed weights/masks and the output.
        nodes = [x_ref[...]] + [None] * depth
        parts = [[] for _ in range(depth + 1)]         # per-sink channel chunks (cat order)

        for j in range(depth):                         # sources in ascending order
            if j > 0 and parts[j]:                     # finalize node j before first use
                nodes[j] = (parts[j][0] if len(parts[j]) == 1
                            else jnp.concatenate(parts[j], axis=0))
            g = groups_by_src.get(j)
            if g is None:
                continue
            src = nodes[j]                             # (C_src, L)
            blocks = []
            for t in g["taps"]:                        # in-kernel im2col (roll + mask)
                d = (t // 3 - 1) * W + (t % 3 - 1)     # flat tap offset
                if d == 0:
                    blocks.append(src)
                else:
                    # a[c, p] = src[c, p + d], zeroed wherever the tap leaves the image
                    # (mask also kills any cross-image / wraparound lanes).
                    blocks.append(pltpu.roll(src, (-d) % L, axis=1) * masks[t:t + 1, :])
            blocks.append(ones_row)                    # folds the bias into the matmul
            stack = jnp.concatenate(blocks, axis=0)    # (T*C_src + 1, L)
            w = w_ref[g["widx"]][:g["rows"], :g["cols"]]
            out = jnp.dot(w, stack, preferred_element_type=jnp.float32)   # (R_j, L)
            r = 0
            for sink, rc in g["sink_rows"]:
                parts[sink].append(out[r:r + rc, :])
                r += rc

        y = (parts[depth][0] if len(parts[depth]) == 1
             else jnp.concatenate(parts[depth], axis=0))
        o_ref[...] = y.astype(o_ref.dtype)             # ONE full-width, unmasked store

    return kernel


class LearnableCellPallas:
    """JAX/Pallas port of LearnableCell: same genotype parsing, DAG and forward."""

    def __init__(self, C_in, genotype, search_space, do_pool=None, seed=0):
        architecture, use_shared, _ = self._get_conf(genotype)
        assert len(architecture[0]) == len(search_space)
        depth = int((len(architecture) * 2) ** 0.5)
        assert depth * (depth + 1) / 2 == len(architecture)
        self.genotype = genotype
        self.depth = depth
        self.do_pool = do_pool
        self.size_in = [0 for _ in range(depth + 1)]
        self.size_in[0] = C_in

        self.ref_layers = []                    # per-op layers (pure-JAX reference)
        per_src = [[] for _ in range(depth)]    # ops grouped by source node

        base_key = jax.random.PRNGKey(seed)
        layer_idx = 0
        for i in range(1, depth + 1):
            for j in range(i):
                conn = architecture[i * (i - 1) // 2 + j]
                for op, c_out in zip(OPS.keys(), conn):
                    if c_out <= 0:
                        continue
                    kh, kw = OPS[op]
                    c_in = self.size_in[j]
                    wkey, bkey = jax.random.split(
                        jax.random.fold_in(base_key, layer_idx))
                    fan_in = kh * kw * c_in
                    w_hwio = (jax.random.normal(wkey, (kh, kw, c_in, c_out),
                                                jnp.float32)
                              / jnp.sqrt(jnp.float32(fan_in)))
                    b = 0.01 * jax.random.normal(bkey, (c_out,), jnp.float32)
                    self.ref_layers.append(dict(
                        w_oihw=jnp.transpose(w_hwio, (3, 2, 0, 1)), b=b,
                        kh=kh, kw=kw, node_in=j, node_out=i))
                    # Natural append order is (sink ascending, op ascending) == torch.cat
                    # channel order inside each sink.
                    per_src[j].append(dict(sink=i, c_out=c_out, kh=kh, kw=kw,
                                           w_hwio=w_hwio, b=b))
                    self.size_in[i] += c_out
                    layer_idx += 1
        self.C_out = self.size_in[-1]

        # -------- pack one fused (rows x cols) weight matrix per SOURCE node --------
        # rows = sum of c_out over all ops reading the node (ordered sink-asc, op-asc),
        # cols = len(used taps) * c_in + 1 (trailing bias column).
        groups = []
        for j in range(depth):
            ops = per_src[j]
            if not ops:
                continue
            c_in = self.size_in[j]
            taps = sorted(set().union(*[
                set(range(9)) if (o["kh"], o["kw"]) == (3, 3) else {_CENTER_TAP}
                for o in ops]))
            tap_pos = {t: k for k, t in enumerate(taps)}
            rows = sum(o["c_out"] for o in ops)
            cols = len(taps) * c_in + 1
            Wm = jnp.zeros((rows, cols), jnp.float32)
            r = 0
            sink_rows = []
            for o in ops:
                co = o["c_out"]
                if (o["kh"], o["kw"]) == (3, 3):
                    for t in range(9):
                        k = tap_pos[t]
                        Wm = Wm.at[r:r + co, k * c_in:(k + 1) * c_in].set(
                            jnp.transpose(o["w_hwio"][t // 3, t % 3], (1, 0)))
                elif (o["kh"], o["kw"]) == (1, 1):
                    k = tap_pos[_CENTER_TAP]
                    Wm = Wm.at[r:r + co, k * c_in:(k + 1) * c_in].set(
                        jnp.transpose(o["w_hwio"][0, 0], (1, 0)))
                else:
                    raise NotImplementedError((o["kh"], o["kw"]))
                Wm = Wm.at[r:r + co, cols - 1].set(o["b"])        # bias column
                if sink_rows and sink_rows[-1][0] == o["sink"]:
                    sink_rows[-1][1] += co
                else:
                    sink_rows.append([o["sink"], co])
                r += co
            groups.append(dict(src=j, taps=tuple(taps), rows=rows, cols=cols,
                               sink_rows=tuple((s, c) for s, c in sink_rows), W=Wm))

        # Pack ALL group weights into a single operand (n_groups, R_max, K_max).
        R_max = max(g["rows"] for g in groups)
        K_max = max(g["cols"] for g in groups)
        packed = jnp.zeros((len(groups), R_max, K_max), jnp.float32)
        for gi, g in enumerate(groups):
            packed = packed.at[gi, :g["rows"], :g["cols"]].set(g.pop("W"))
            g["widx"] = gi
        self.w_packed = packed
        self.groups = groups                    # metadata only (no arrays)
        self._fn_cache = {}

    @staticmethod
    def _get_conf(genotype):
        architecture, evol_strategy = genotype.split("--")
        architecture = [[int(x) for x in conn.split("|")]
                        for conn in architecture.split("  ")]
        use_shared, dataset = evol_strategy.split("  ")
        return architecture, int(use_shared), int(dataset)

    def get_dataset_n(self):
        return int(self.genotype.split("--")[1].split("  ")[1])

    # ------------------------- fused Pallas forward -------------------------

    def _pallas_fn(self, N, H, W):
        key = (N, H, W)
        if key in self._fn_cache:
            return self._fn_cache[key]
        HW = H * W
        Cin = self.size_in[0]

        # Grid choice: 2 lane-tiles when possible so v7x's two TensorCores both get work
        # (dimension_semantics=('parallel',)); otherwise a single full-extent tile.
        # TODO(synk): query core count at runtime to pick 1 step on single-TC v5e/v6e.
        steps = 2 if (N % 2 == 0 and ((N // 2) * HW) % 128 == 0) else 1
        B = N // steps
        L = B * HW                              # lanes per grid step (batch folded in)

        # Precompute the 9 'same'-padding border masks on the host: (9, HW) tiled to
        # (9, B*HW) so each image chunk of the folded lane axis gets its own border.
        p = jnp.arange(HW, dtype=jnp.int32)
        yy, xx = p // W, p % W
        m = []
        for t in range(9):
            ry, rx = t // 3 - 1, t % 3 - 1
            ok = ((yy + ry >= 0) & (yy + ry < H) & (xx + rx >= 0) & (xx + rx < W))
            m.append(ok.astype(jnp.float32))
        mask = jnp.tile(jnp.stack(m, axis=0), (1, B))        # (9, L)

        # VMEM budget, sized against the SMALLEST scoped default across chips
        # (v7x: 32 MiB scoped / 64 MiB physical per TC), with double-buffered I/O.
        n_g, R_max, K_max = self.w_packed.shape
        R_pad = ((R_max + 7) // 8) * 8
        K_pad = ((K_max + 127) // 128) * 128
        L_pad = ((L + 127) // 128) * 128
        vmem_est = 4 * (
            2 * Cin * L_pad                              # input block (double-buffered)
            + 2 * self.C_out * L_pad                     # output block (double-buffered)
            + 2 * 16 * L_pad                             # (9,L) mask, sublane-padded
            + 2 * n_g * R_pad * K_pad                    # packed weights
            + sum((len(g["taps"]) * self.size_in[g["src"]] + 1) * L_pad
                  for g in self.groups)                  # im2col stacks (live values)
            + sum(self.size_in[i] * L_pad for i in range(1, self.depth + 1)))
        assert vmem_est < 16 * 1024 * 1024, (
            f"per-step VMEM estimate {vmem_est} B too large; add spatial/batch tiling")

        flops = 2 * N * HW * sum(g["rows"] * g["cols"] for g in self.groups)
        bytes_accessed = 4 * (N * HW * (Cin + self.C_out)
                              + int(self.w_packed.size) + 9 * L)
        cost = pl.CostEstimate(flops=flops, transcendentals=0,
                               bytes_accessed=bytes_accessed)

        fn = pl.pallas_call(
            _build_cell_kernel(self.groups, self.depth, W, L),
            out_shape=jax.ShapeDtypeStruct((self.C_out, N * HW), jnp.float32),
            grid=(steps,),
            in_specs=[
                pl.BlockSpec((Cin, L), lambda n: (0, n)),            # activations
                pl.BlockSpec((9, L), lambda n: (0, 0)),              # masks (resident)
                pl.BlockSpec((n_g, R_max, K_max), lambda n: (0, 0, 0)),  # weights+bias
            ],
            out_specs=pl.BlockSpec((self.C_out, L), lambda n: (0, n)),
            compiler_params=pltpu.CompilerParams(
                dimension_semantics=("parallel",)),
            cost_estimate=cost,
        )
        self._fn_cache[key] = (fn, mask)
        return fn, mask

    def __call__(self, x_nchw):
        N, C, H, W = x_nchw.shape
        assert C == self.size_in[0]
        # Channels-major, batch-in-lanes layout: one tiny HBM transpose in the wrapper,
        # then everything in the kernel is lane-dense (C, B*HW).
        x_flat = jnp.transpose(x_nchw, (1, 0, 2, 3)).reshape(
            C, N * H * W).astype(jnp.float32)
        fn, mask = self._pallas_fn(N, H, W)
        y = fn(x_flat, mask, self.w_packed)                  # (C_out, N*HW)
        y = jnp.transpose(y.reshape(self.C_out, N, H, W), (1, 0, 2, 3))
        img_size = min(H, W)
        # TODO(synk): Python-side do_pool latch mirrors the PyTorch module; keep this
        # wrapper out of jit (trace-time state would diverge from eager semantics).
        if self.do_pool or (self.do_pool is None and img_size > 50):
            self.do_pool = True
            y = _avg_pool_3x3_s2_nchw(y)
        return y

    # --------------- pure-JAX reference (XLA convs), same DAG ---------------

    def reference(self, x_nchw):
        inputs = [[] for _ in range(self.depth + 1)]
        inputs[0] = x_nchw
        current = 1
        for Lr in self.ref_layers:
            l_in, l_out = Lr["node_in"], Lr["node_out"]
            if l_out != current:
                inputs[current] = jnp.concatenate(inputs[current], axis=1)
                current = l_out
            ph, pw = Lr["kh"] // 2, Lr["kw"] // 2
            out = lax.conv_general_dilated(
                inputs[l_in], Lr["w_oihw"], window_strides=(1, 1),
                padding=[(ph, ph), (pw, pw)],
                dimension_numbers=("NCHW", "OIHW", "NCHW"))
            inputs[l_out].append(out + Lr["b"].reshape(1, -1, 1, 1))
        x = jnp.concatenate(inputs[-1], axis=1)
        img_size = min(x.shape[2], x.shape[3])
        if self.do_pool or (self.do_pool is None and img_size > 50):
            x = _avg_pool_3x3_s2_nchw(x)
        return x


# ----------------------------------- main -----------------------------------

if __name__ == "__main__":
    # Genotype: depth-2 cell, 3 connections, 2 ops per connection (search space size 2):
    #   (1<-0): conv3x3 -> 2 ch
    #   (2<-0): conv1x1 -> 3 ch
    #   (2<-1): conv3x3 -> 1 ch, conv1x1 -> 2 ch        => C_out = 6
    genotype = "2|0  0|3  1|2--1  0"
    search_space = list(OPS.keys())
    C_in, N, H, W = 4, 2, 16, 16

    cell = LearnableCellPallas(C_in, genotype, search_space, do_pool=None, seed=0)
    x = jax.random.normal(jax.random.PRNGKey(0), (N, C_in, H, W), jnp.float32)

    out = jax.block_until_ready(cell(x))

    # Shape check: output channels = 3 + 1 + 2 = 6, spatial preserved (16 <= 50 -> no pool).
    assert out.shape == (N, cell.C_out, H, W), out.shape
    assert out.dtype == jnp.float32

    # Numerical check against the XLA-conv reference of the same graph.
    ref = jax.block_until_ready(cell.reference(x))
    err = float(jnp.max(jnp.abs(out - ref)))
    assert jnp.allclose(out, ref, rtol=2e-4, atol=5e-5), err

    print("KERNEL_OK")
</pallas_src>

<mosaic_0001>
module attributes {stable_mosaic.version = 11 : i64} {
  func.func @kernel(%arg0: i32, %arg1: memref<4x256xf32, #tpu.memory_space<vmem>>, %arg2: memref<9x256xf32, #tpu.memory_space<vmem>>, %arg3: memref<2x5x37xf32, #tpu.memory_space<vmem>>, %arg4: memref<6x256xf32, #tpu.memory_space<vmem>>) attributes {dimension_semantics = [#tpu.dimension_semantics<parallel>], iteration_bounds = array<i64: 2>, scalar_prefetch = 0 : i64, scratch_operands = 0 : i64, tpu.core_type = #tpu.core_type<tc>, window_params = [{transform_indices = @transform_0, window_bounds = array<i64: 4, 256>}, {pipeline_mode = #tpu.pipeline_mode<synchronous>, transform_indices = @transform_1, window_bounds = array<i64: 9, 256>}, {pipeline_mode = #tpu.pipeline_mode<synchronous>, transform_indices = @transform_2, window_bounds = array<i64: 2, 5, 37>}, {transform_indices = @transform_3, window_bounds = array<i64: 6, 256>}]} {
    %c0 = arith.constant 0 : index
    %c0_0 = arith.constant 0 : index
    %0 = vector.load %arg2[%c0, %c0_0] : memref<9x256xf32, #tpu.memory_space<vmem>>, vector<9x256xf32>
    %cst = arith.constant 1.000000e+00 : f32
    %1 = vector.broadcast %cst : f32 to vector<1x256xf32>
    %c0_1 = arith.constant 0 : index
    %c0_2 = arith.constant 0 : index
    %2 = vector.load %arg1[%c0_1, %c0_2] : memref<4x256xf32, #tpu.memory_space<vmem>>, vector<4x256xf32>
    %c17_i32 = arith.constant 17 : i32
    %3 = tpu.dynamic_rotate %2 by %c17_i32 dim 1 : vector<4x256xf32>, i32 -> vector<4x256xf32>
    %4 = vector.extract_strided_slice %0 {offsets = [0, 0], sizes = [1, 256], strides = [1, 1]} : vector<9x256xf32> to vector<1x256xf32>
    %5 = vector.broadcast %4 : vector<1x256xf32> to vector<4x256xf32>
    %6 = arith.mulf %3, %5 : vector<4x256xf32>
    %c16_i32 = arith.constant 16 : i32
    %7 = tpu.dynamic_rotate %2 by %c16_i32 dim 1 : vector<4x256xf32>, i32 -> vector<4x256xf32>
    %8 = vector.extract_strided_slice %0 {offsets = [1, 0], sizes = [1, 256], strides = [1, 1]} : vector<9x256xf32> to vector<1x256xf32>
    %9 = vector.broadcast %8 : vector<1x256xf32> to vector<4x256xf32>
    %10 = arith.mulf %7, %9 : vector<4x256xf32>
    %c15_i32 = arith.constant 15 : i32
    %11 = tpu.dynamic_rotate %2 by %c15_i32 dim 1 : vector<4x256xf32>, i32 -> vector<4x256xf32>
    %12 = vector.extract_strided_slice %0 {offsets = [2, 0], sizes = [1, 256], strides = [1, 1]} : vector<9x256xf32> to vector<1x256xf32>
    %13 = vector.broadcast %12 : vector<1x256xf32> to vector<4x256xf32>
    %14 = arith.mulf %11, %13 : vector<4x256xf32>
    %c1_i32 = arith.constant 1 : i32
    %15 = tpu.dynamic_rotate %2 by %c1_i32 dim 1 : vector<4x256xf32>, i32 -> vector<4x256xf32>
    %16 = vector.extract_strided_slice %0 {offsets = [3, 0], sizes = [1, 256], strides = [1, 1]} : vector<9x256xf32> to vector<1x256xf32>
    %17 = vector.broadcast %16 : vector<1x256xf32> to vector<4x256xf32>
    %18 = arith.mulf %15, %17 : vector<4x256xf32>
    %c255_i32 = arith.constant 255 : i32
    %19 = tpu.dynamic_rotate %2 by %c255_i32 dim 1 : vector<4x256xf32>, i32 -> vector<4x256xf32>
    %20 = vector.extract_strided_slice %0 {offsets = [5, 0], sizes = [1, 256], strides = [1, 1]} : vector<9x256xf32> to vector<1x256xf32>
    %21 = vector.broadcast %20 : vector<1x256xf32> to vector<4x256xf32>
    %22 = arith.mulf %19, %21 : vector<4x256xf32>
    %c241_i32 = arith.constant 241 : i32
    %23 = tpu.dynamic_rotate %2 by %c241_i32 dim 1 : vector<4x256xf32>, i32 -> vector<4x256xf32>
    %24 = vector.extract_strided_slice %0 {offsets = [6, 0], sizes = [1, 256], strides = [1, 1]} : vector<9x256xf32> to vector<1x256xf32>
    %25 = vector.broadcast %24 : vector<1x256xf32> to vector<4x256xf32>
    %26 = arith.mulf %23, %25 : vector<4x256xf32>
    %c240_i32 = arith.constant 240 : i32
    %27 = tpu.dynamic_rotate %2 by %c240_i32 dim 1 : vector<4x256xf32>, i32 -> vector<4x256xf32>
    %28 = vector.extract_strided_slice %0 {offsets = [7, 0], sizes = [1, 256], strides = [1, 1]} : vector<9x256xf32> to vector<1x256xf32>
    %29 = vector.broadcast %28 : vector<1x256xf32> to vector<4x256xf32>
    %30 = arith.mulf %27, %29 : vector<4x256xf32>
    %c239_i32 = arith.constant 239 : i32
    %31 = tpu.dynamic_rotate %2 by %c239_i32 dim 1 : vector<4x256xf32>, i32 -> vector<4x256xf32>
    %32 = vector.extract_strided_slice %0 {offsets = [8, 0], sizes = [1, 256], strides = [1, 1]} : vector<9x256xf32> to vector<1x256xf32>
    %33 = vector.broadcast %32 : vector<1x256xf32> to vector<4x256xf32>
    %34 = arith.mulf %31, %33 : vector<4x256xf32>
    %35 = tpu.concatenate %6, %10, %14, %18, %2, %22, %26, %30, %34, %1 in 0 : vector<4x256xf32>, vector<4x256xf32>, vector<4x256xf32>, vector<4x256xf32>, vector<4x256xf32>, vector<4x256xf32>, vector<4x256xf32>, vector<4x256xf32>, vector<4x256xf32>, vector<1x256xf32> -> vector<37x256xf32>
    %c0_3 = arith.constant 0 : index
    %c0_4 = arith.constant 0 : index
    %c0_5 = arith.constant 0 : index
    %36 = vector.load %arg3[%c0_3, %c0_4, %c0_5] : memref<2x5x37xf32, #tpu.memory_space<vmem>>, vector<1x5x37xf32>
    %37 = vector.shape_cast %36 : vector<1x5x37xf32> to vector<5x37xf32>
    %cst_6 = arith.constant dense<0.000000e+00> : vector<5x256xf32>
    %38 = tpu.matmul %37, %35, %cst_6 {dimension_numbers = #tpu.dot_dimension_numbers<[1], [0], [0], [1], [0, 0, 1, 1], [], []>} : vector<5x37xf32>, vector<37x256xf32>, vector<5x256xf32> -> vector<5x256xf32>
    %39 = vector.extract_strided_slice %38 {offsets = [0, 0], sizes = [2, 256], strides = [1, 1]} : vector<5x256xf32> to vector<2x256xf32>
    %40 = vector.extract_strided_slice %38 {offsets = [2, 0], sizes = [3, 256], strides = [1, 1]} : vector<5x256xf32> to vector<3x256xf32>
    %c17_i32_7 = arith.constant 17 : i32
    %41 = tpu.dynamic_rotate %39 by %c17_i32_7 dim 1 : vector<2x256xf32>, i32 -> vector<2x256xf32>
    %42 = vector.extract_strided_slice %0 {offsets = [0, 0], sizes = [1, 256], strides = [1, 1]} : vector<9x256xf32> to vector<1x256xf32>
    %43 = vector.broadcast %42 : vector<1x256xf32> to vector<2x256xf32>
    %44 = arith.mulf %41, %43 : vector<2x256xf32>
    %c16_i32_8 = arith.constant 16 : i32
    %45 = tpu.dynamic_rotate %39 by %c16_i32_8 dim 1 : vector<2x256xf32>, i32 -> vector<2x256xf32>
    %46 = vector.extract_strided_slice %0 {offsets = [1, 0], sizes = [1, 256], strides = [1, 1]} : vector<9x256xf32> to vector<1x256xf32>
    %47 = vector.broadcast %46 : vector<1x256xf32> to vector<2x256xf32>
    %48 = arith.mulf %45, %47 : vector<2x256xf32>
    %c15_i32_9 = arith.constant 15 : i32
    %49 = tpu.dynamic_rotate %39 by %c15_i32_9 dim 1 : vector<2x256xf32>, i32 -> vector<2x256xf32>
    %50 = vector.extract_strided_slice %0 {offsets = [2, 0], sizes = [1, 256], strides = [1, 1]} : vector<9x256xf32> to vector<1x256xf32>
    %51 = vector.broadcast %50 : vector<1x256xf32> to vector<2x256xf32>
    %52 = arith.mulf %49, %51 : vector<2x256xf32>
    %c1_i32_10 = arith.constant 1 : i32
    %53 = tpu.dynamic_rotate %39 by %c1_i32_10 dim 1 : vector<2x256xf32>, i32 -> vector<2x256xf32>
    %54 = vector.extract_strided_slice %0 {offsets = [3, 0], sizes = [1, 256], strides = [1, 1]} : vector<9x256xf32> to vector<1x256xf32>
    %55 = vector.broadcast %54 : vector<1x256xf32> to vector<2x256xf32>
    %56 = arith.mulf %53, %55 : vector<2x256xf32>
    %c255_i32_11 = arith.constant 255 : i32
    %57 = tpu.dynamic_rotate %39 by %c255_i32_11 dim 1 : vector<2x256xf32>, i32 -> vector<2x256xf32>
    %58 = vector.extract_strided_slice %0 {offsets = [5, 0], sizes = [1, 256], strides = [1, 1]} : vector<9x256xf32> to vector<1x256xf32>
    %59 = vector.broadcast %58 : vector<1x256xf32> to vector<2x256xf32>
    %60 = arith.mulf %57, %59 : vector<2x256xf32>
    %c241_i32_12 = arith.constant 241 : i32
    %61 = tpu.dynamic_rotate %39 by %c241_i32_12 dim 1 : vector<2x256xf32>, i32 -> vector<2x256xf32>
    %62 = vector.extract_strided_slice %0 {offsets = [6, 0], sizes = [1, 256], strides = [1, 1]} : vector<9x256xf32> to vector<1x256xf32>
    %63 = vector.broadcast %62 : vector<1x256xf32> to vector<2x256xf32>
    %64 = arith.mulf %61, %63 : vector<2x256xf32>
    %c240_i32_13 = arith.constant 240 : i32
    %65 = tpu.dynamic_rotate %39 by %c240_i32_13 dim 1 : vector<2x256xf32>, i32 -> vector<2x256xf32>
    %66 = vector.extract_strided_slice %0 {offsets = [7, 0], sizes = [1, 256], strides = [1, 1]} : vector<9x256xf32> to vector<1x256xf32>
    %67 = vector.broadcast %66 : vector<1x256xf32> to vector<2x256xf32>
    %68 = arith.mulf %65, %67 : vector<2x256xf32>
    %c239_i32_14 = arith.constant 239 : i32
    %69 = tpu.dynamic_rotate %39 by %c239_i32_14 dim 1 : vector<2x256xf32>, i32 -> vector<2x256xf32>
    %70 = vector.extract_strided_slice %0 {offsets = [8, 0], sizes = [1, 256], strides = [1, 1]} : vector<9x256xf32> to vector<1x256xf32>
    %71 = vector.broadcast %70 : vector<1x256xf32> to vector<2x256xf32>
    %72 = arith.mulf %69, %71 : vector<2x256xf32>
    %73 = tpu.concatenate %44, %48, %52, %56, %39, %60, %64, %68, %72, %1 in 0 : vector<2x256xf32>, vector<2x256xf32>, vector<2x256xf32>, vector<2x256xf32>, vector<2x256xf32>, vector<2x256xf32>, vector<2x256xf32>, vector<2x256xf32>, vector<2x256xf32>, vector<1x256xf32> -> vector<19x256xf32>
    %c1 = arith.constant 1 : index
    %c0_15 = arith.constant 0 : index
    %c0_16 = arith.constant 0 : index
    %74 = vector.load %arg3[%c1, %c0_15, %c0_16] : memref<2x5x37xf32, #tpu.memory_space<vmem>>, vector<1x5x37xf32>
    %75 = vector.shape_cast %74 : vector<1x5x37xf32> to vector<5x37xf32>
    %76 = vector.extract_strided_slice %75 {offsets = [0, 0], sizes = [3, 19], strides = [1, 1]} : vector<5x37xf32> to vector<3x19xf32>
    %cst_17 = arith.constant dense<0.000000e+00> : vector<3x256xf32>
    %77 = tpu.matmul %76, %73, %cst_17 {dimension_numbers = #tpu.dot_dimension_numbers<[1], [0], [0], [1], [0, 0, 1, 1], [], []>} : vector<3x19xf32>, vector<19x256xf32>, vector<3x256xf32> -> vector<3x256xf32>
    %78 = tpu.concatenate %40, %77 in 0 : vector<3x256xf32>, vector<3x256xf32> -> vector<6x256xf32>
    %c0_18 = arith.constant 0 : index
    %c0_19 = arith.constant 0 : index
    %79 = vector.load %arg4[%c0_18, %c0_19] : memref<6x256xf32, #tpu.memory_space<vmem>>, vector<6x256xf32>
    tpu.vector_store %arg4[%c0_18, %c0_19], %78 {strides = array<i32>} : memref<6x256xf32, #tpu.memory_space<vmem>>, vector<6x256xf32>,
    return
  }
  func.func @transform_0(%arg0: i32) -> (i32, i32) {
    %c0_i32 = arith.constant 0 : i32
    %c0_i32_0 = arith.constant 0 : i32
    return %c0_i32, %arg0 : i32, i32
  }
  func.func @transform_1(%arg0: i32) -> (i32, i32) {
    %c0_i32 = arith.constant 0 : i32
    %c0_i32_0 = arith.constant 0 : i32
    %c0_i32_1 = arith.constant 0 : i32
    return %c0_i32, %c0_i32_0 : i32, i32
  }
  func.func @transform_2(%arg0: i32) -> (i32, i32, i32) {
    %c0_i32 = arith.constant 0 : i32
    %c0_i32_0 = arith.constant 0 : i32
    %c0_i32_1 = arith.constant 0 : i32
    %c0_i32_2 = arith.constant 0 : i32
    return %c0_i32, %c0_i32_0, %c0_i32_1 : i32, i32, i32
  }
  func.func @transform_3(%arg0: i32) -> (i32, i32) {
    %c0_i32 = arith.constant 0 : i32
    %c0_i32_0 = arith.constant 0 : i32
    return %c0_i32, %arg0 : i32, i32
  }
}

</mosaic_0001>

<bundles_post_ra>
// kernel: tpu_custom_call.1
= control target key start
LH: loop header
LB: loop body
LE: loop exit
PB: predicated region body
PF: predicated region fallthrough
CT: control target
= control target key end

     0   :  { %8 = vsyncpa [#allocation3], 0  ;;  %s1393_s0 = inlined_call_operand.vmem [shape: f32[4,512], index: 0, kind: input, shape index: {}]   ;;  %s1394_s1 = inlined_call_operand.hbm [shape: f32[9,256], index: 1, kind: input, shape index: {}]   ;;  %s1395_s2 = inlined_call_operand.vmem [shape: f32[2,5,37], index: 2, kind: input, shape index: {}]   ;;  %s1396_s3 = inlined_call_operand.hbm [shape: f32[6,512], index: 3, kind: output, shape index: {}]  }
   0x1   :  { %9 = vsyncpa [#allocation4], 0 }
   0x2   :  { %11 = vsyncpa [#allocation4 + $0x1], 0  ;;  %s980_s12 = smov 0   ;;  %s982_s13 = smov 0  }
   0x3   :  { %s984_s14 = smov 0   ;;  %s986_s15 = smov 0  }
   0x4 LB: > { %s1001_s16 = sadd.s32 4294967295, %s945_s15   ;;  %s753_s17 = sadd.s32 4294967294, %s945_s15   ;;  %s945_s15 = sphi %s986_s15, %s1412_s15   ;;  %s941_s14 = sphi %s984_s14, %s1411_s14   ;;  %s937_s13 = sphi %s982_s13, %s1410_s13   ;;  %s933_s12 = sphi %s980_s12, %s1409_s12  }
   0x5   : > { %s1005_s18 = sadd.s32 1, %s945_s15   ;;  %s92_s19 = sadd.s32 1, %s941_s14 }
   0x6   : > { %s89_s20 = ssub.s32 %s945_s15, %s1005_s18  ;;  %p102_p0 = scmp.ne.s32.totalorder %s941_s14, %s937_s13 }
   0x7   : > { %p90_p1 = scmp.eq.s32.totalorder %s89_s20, 0  ;;  %p103_p2 = scmp.eq.s32.totalorder %s1001_s16, 1 }
   0x8   : > { %p108_p3 = scmp.ne.s32.totalorder %s937_s13, %s933_s12  ;;  %p109_p4 = scmp.eq.s32.totalorder %s753_s17, 1 }
   0x9   : > { %s1016_s21 = scalar_select %p90_p1, %s941_s14, %s92_s19  }
   0xa   : > { %p1018_p5 = por %p103_p2, %p102_p0  ;;  %p1022_p6 = por %p109_p4, %p108_p3 }
   0xb   : > { %p754_p7 = scmp.ge.s32.totalorder %s945_s15, 1  ;;  %p116_p8 = scmp.lt.s32.totalorder %s945_s15, 3 }
   0xc   : > { %s1400_s22 = scalar_select %p1018_p5, 1, 0 }
   0xd   : > { %s1401_s23 = scalar_select %p1022_p6, 1, 0 }
   0xe   : > { %p1397_p9 = scmp.eq.s32.totalorder %s1001_s16, 0  ;;  %p1029_p10 = pnand %p754_p7, %p116_p8 }
   0xf   : > { %s947_s25 = smov [#allocation2]   ;;  %s851_s30 = scalar_lea.hbm %s1394_s1, 512 }
  0x10   : > { %s1402_s24 = scalar_select %p1029_p10, 1, 0 }
  0x11   : > { %s128_s26 = sshll.u32 %s947_s25, 4  ;;  %p795_p11 = pneg %p1029_p10  ;;  %s129_s26 = int_to_ptr.vmem [resolvable:$true] %s128_s26 }
  0x12   : > { %p852_p13 = scmp.ne.s32.totalorder %s1394_s1, %s851_s30  ;;  %p858_p3 = scmp.lt.u32.totalorder %s851_s30, %s1394_s1 }
  0x13   : > { %p1037_p12 = pnand %p1397_p9, %p795_p11 }
  0x15   : > { %p853_p0 = pneg %p1037_p12 }
  0x17   : > { %p854_p1 = pnand %p853_p0, %p852_p13 }
  0x19   : > { %p855_p2 = pneg %p854_p1 }
  0x1b   : > { %p860_p4 = pnand %p858_p3, %p855_p2 }
  0x1d   : > { %863 = shalt.err (!%p860_p4)
}
  0x1e   : > { %s864_s8 = scalar_lea.vmem %s129_s26, 512  ;;  %p872_p9 = scmp.lt.s32.totalorder %s129_s26, %s129_s26 }
  0x1f   : > { %p865_p7 = scmp.ne.s32.totalorder %s129_s26, %s864_s8  ;;  %p873_p6 = scmp.lt.s32.totalorder %s864_s8, %s864_s8 }
  0x21   : > { %p867_p8 = pnand %p865_p7, %p853_p0  ;;  %p874_p5 = por %p873_p6, %p872_p9 }
  0x23   : > { %p868_p11 = pneg %p867_p8 }
  0x25   : > { %p875_p10 = pnand %p874_p5, %p868_p11 }
  0x27   : > { %878 = shalt.err (!%p875_p10)
}
  0x28   : > { %s948_s9 = smov 256   ;;  %s949_s10 = smov 16  }
  0x29   : > { %798 = dma.hbm_to_vmem [thread:$0]  (!%p1037_p12), %s1394_s1, 512, %s129_s26, [#allocation3], %s948_s9, %s948_s9, %s949_s10  }
  0x2a   : > { %p1404_p13 = scmp.ne.s32.totalorder %s1402_s24, 0 }
  0x2b   : > { %p1405_p1 = scmp.eq.s32.totalorder (!%p1404_p13), %s1001_s16, 0 }
  0x2c   : > { %156 = sbr.rel (%p1404_p13) target bundleno = 806 (0x326), region = 32 }
  0x33   : > { %924 = dma.done.wait (%p1405_p1), [#allocation3], 512   ;;  %p1406_p0 = pmov %p1405_p1 }
  0x34   : > { %s760_s19 = sshll.u32 %s1001_s16, 1  ;;  %s950_s26 = smov 1   ;;  %v956_v2 = vmov 0.0   ;;  %v199_v3 = vlaneseq  ;;  %v1110_v9 = vld [vmem:[#allocation2] sm:$0xff]  ;;  %v1112_v10 = vld [vmem:[#allocation2 + $0x8] sm:$0xff]  ;;  %vm357_vm4 = vcmask 1043456  }
  0x35   : > { %926 = vsyncadd (%p1406_p0), [#allocation3], 4294966784  ;;  %p181_p5 = scmp.lt.s32.totalorder %s760_s19, 3  ;;  %s951_s24 = smov 16   ;;  %444 = vmatprep.mubr.f32.mxu0 %v956_v2  ;;  %644 = vmatprep.mubr.f32.mxu1 %v956_v2  ;;  %vm373_vm9 = vcmask 1044480   ;;  %vm369_vm10 = vcmask 302080  }
  0x36   : > { %s952_s29 = smov 17   ;;  %s953_s30 = smov 15   ;;  %v1105_v4 = vshrl.u32 %v199_v3, 7  ;;  %v1107_v5 = vand.u32 127, %v199_v3  ;;  %vm551_vm11 = vcmask 1041408   ;;  %vm556_vm12 = vcmask 1045504  }
  0x37   : > { %s1414_s19 = smov (!%p181_p5, %s760_s19), 3  ;;  %s954_s4 = smov 127   ;;  %vm573_vm13 = vcmask 1042432   ;;  %vm569_vm14 = vcmask 154624  }
  0x38   : > { %s761_s20 = sshll.u32 %s1414_s19, 2  ;;  %s955_s5 = smov 112   ;;  %v257_v8 = vsub.s32 3, %v1105_v4  ;;  %v223_v11 = vsub.s32 1, %v1105_v4  ;;  %vm252_vm0 = vcmp.lt.s32.totalorder %v1107_v5, 1  ;;  %v206_v14 = vsub.s32 0, %v1105_v4 }
  0x39   : > { %s184_s28 = scalar_lea.vmem %s1393_s0, %s761_s20  ;;  %s957_s6 = smov 113   ;;  %vm218_vm1 = vcmp.lt.s32.totalorder %v1107_v5, 16  ;;  %v240_v17 = vsub.s32 2, %v1105_v4  ;;  %vm201_vm2 = vcmp.lt.s32.totalorder %v1107_v5, 17  ;;  %vm235_vm3 = vcmp.lt.s32.totalorder %v1107_v5, 15 }
  0x3a   : > { %v1067_v0 = vld [vmem:[%s184_s28] sm:$0xff]  ;;  %s958_s7 = smov 111   ;;  %v1118_v15 = vrot.slane %v1110_v9, %v257_v8  ;;  %v1121_v16 = vrot.slane %v1112_v10, %v257_v8  ;;  %v1130_v20 = vrot.slane %v1110_v9, %v223_v11  ;;  %v1133_v21 = vrot.slane %v1112_v10, %v223_v11  ;;  %s177_s17 = sand.u32 1, %s937_s13  }
  0x3b   : > { %248 = vrot.lane.b32.xlu1 %v1067_v0, %s950_s26  ;;  %214 = vrot.lane.b32.xlu0 %v1067_v0, %s951_s24  ;;  %v1075_v1 = vcombine.high %v1067_v0, %v1067_v0  ;;  %v1137_v23 = vrot.slane %v1110_v9, %v206_v14  ;;  %v1140_v24 = vrot.slane %v1112_v10, %v206_v14  ;;  %v274_v36 = vsub.s32 5, %v1105_v4  ;;  %s759_s19 = sshll.u32 %s177_s17, 4  ;;  %s776_s20 = sshll.u32 %s1001_s16, 8 }
  0x3c   : > { %v1152_v32 = vrot.slane %v1110_v9, %v240_v17  ;;  %v1155_v33 = vrot.slane %v1112_v10, %v240_v17  ;;  %vm269_vm5 = vcmp.lt.s32.totalorder %v1107_v5, 127  ;;  %v308_v41 = vsub.s32 7, %v1105_v4  ;;  %s179_s25 = scalar_lea.vmem [#allocation5], %s759_s19  ;;  %s668_s16 = scalar_lea.sflag [#allocation4], %s177_s17 }
  0x3d   : > { %v1173_v50 = vrot.slane %v1110_v9, %v274_v36  ;;  %v1176_v51 = vrot.slane %v1112_v10, %v274_v36  ;;  %vm303_vm6 = vcmp.lt.s32.totalorder %v1107_v5, 112  ;;  %v291_v2 = vsub.s32 6, %v1105_v4  ;;  %s682_s27 = sshll.u32 %s179_s25, 4  ;;  %p1407_p9 = scmp.ne.s32.totalorder %s1400_s22, 0  ;;  %s1352_s27 = int_to_ptr.vmem [resolvable:$true] %s682_s27 }
  0x3e   : > { %v1188_v62 = vrot.slane %v1110_v9, %v308_v41  ;;  %v1191_v63 = vrot.slane %v1112_v10, %v308_v41  ;;  %vm286_vm7 = vcmp.lt.s32.totalorder %v1107_v5, 113  ;;  %vm320_vm8 = vcmp.lt.s32.totalorder %v1107_v5, 111  ;;  %v767_v5 = vld [vmem:[%s1395_s2 + $0x8] sm:$0x1f] }
  0x3f   : > { %195 = vrot.lane.b32.xlu0 %v1067_v0, %s952_s29  ;;  %250 = vrot.lane.b32.xlu1 %v1075_v1, %s950_s26  ;;  %v1204_v14 = vrot.slane %v1110_v9, %v291_v2  ;;  %v1207_v17 = vrot.slane %v1112_v10, %v291_v2  ;;  %v1216_v10 = vld [vmem:[#allocation2 + $0x10] ss:$0 sm:$0xff] }
  0x43   : > { %197 = vrot.lane.b32.xlu1 %v1075_v1, %s952_s29  ;;  %216 = vrot.lane.b32.xlu0 %v1075_v1, %s951_s24 }
  0x47   : > { %233 = vrot.lane.b32.xlu1 %v1075_v1, %s953_s30  ;;  %231 = vrot.lane.b32.xlu0 %v1067_v0, %s953_s30 }
  0x4b   : > { %267 = vrot.lane.b32.xlu1 %v1075_v1, %s954_s4  ;;  %265 = vrot.lane.b32.xlu0 %v1067_v0, %s954_s4 }
  0x4f   : > { %301 = vrot.lane.b32.xlu1 %v1075_v1, %s955_s5  ;;  %299 = vrot.lane.b32.xlu0 %v1067_v0, %s955_s5 }
  0x53   : > { %284 = vrot.lane.b32.xlu1 %v1075_v1, %s957_s6  ;;  %282 = vrot.lane.b32.xlu0 %v1067_v0, %s957_s6 }
  0x57   : > { %318 = vrot.lane.b32.xlu1 %v1075_v1, %s958_s7  ;;  %316 = vrot.lane.b32.xlu0 %v1067_v0, %s958_s7 }
  0xad   : > { %v249_v6 = vpop.permute.xlu1 %248  ;;  %v215_v7 = vpop.permute.xlu0 %214 }
  0xb1   : > { %v196_v12 = vpop.permute.xlu0 %195  ;;  %v251_v13 = vpop.permute.xlu1 %250 }
  0xb2   : > { %v253_v18 = vsel %vm252_vm0, %v249_v6, %v251_v13  ;;  %v254_v19 = vsel %vm252_vm0, %v251_v13, %v249_v6 }
  0xb3   : > { %v263_v26 = vmul.f32 %v1118_v15, %v254_v19  ;;  %v264_v27 = vmul.f32 %v1121_v16, %v253_v18 }
  0xb5   : > { %v198_v22 = vpop.permute.xlu1 %197  ;;  %v217_v25 = vpop.permute.xlu0 %216  ;;  %v341_v42 = vrot.slane %v263_v26, 4  ;;  %v342_v43 = vrot.slane %v264_v27, 4 }
  0xb6   : > { %v219_v28 = vsel %vm218_vm1, %v215_v7, %v217_v25  ;;  %v220_v29 = vsel %vm218_vm1, %v217_v25, %v215_v7  ;;  %v202_v34 = vsel %vm201_vm2, %v196_v12, %v198_v22  ;;  %v203_v35 = vsel %vm201_vm2, %v198_v22, %v196_v12 }
  0xb7   : > { %v229_v30 = vmul.f32 %v1130_v20, %v220_v29  ;;  %v230_v31 = vmul.f32 %v1133_v21, %v219_v28  ;;  %v212_v46 = vmul.f32 %v1137_v23, %v203_v35  ;;  %v213_v47 = vmul.f32 %v1140_v24, %v202_v34 }
  0xb9   : > { %v335_v37 = vrot.slane %v229_v30, 4  ;;  %v336_v38 = vrot.slane %v230_v31, 4  ;;  %v234_v39 = vpop.permute.xlu1 %233  ;;  %v232_v40 = vpop.permute.xlu0 %231  ;;  %v1218_v31 = vld [vmem:[#allocation2 + $0x18] ss:$0 sm:$0xff] }
  0xba   : > { %v236_v44 = vsel %vm235_vm3, %v232_v40, %v234_v39  ;;  %v237_v45 = vsel %vm235_vm3, %v234_v39, %v232_v40 }
  0xbb   : > { %v246_v48 = vmul.f32 %v1152_v32, %v237_v45  ;;  %v247_v49 = vmul.f32 %v1155_v33, %v236_v44  ;;  %v359_v54 = vsel %vm357_vm4, %v213_v47, %v336_v38  ;;  %v358_v56 = vsel %vm357_vm4, %v212_v46, %v335_v37  ;;  %v368_v46 = vld [vmem:[%s1395_s2] sm:$0x1f] }
  0xbd   : > { %v268_v52 = vpop.permute.xlu1 %267  ;;  %v266_v53 = vpop.permute.xlu0 %265  ;;  %v361_v55 = vsel %vm357_vm4, %v247_v49, %v342_v43  ;;  %v360_v57 = vsel %vm357_vm4, %v246_v48, %v341_v42 }
  0xbe   : > { %v270_v58 = vsel %vm269_vm5, %v266_v53, %v268_v52  ;;  %v271_v59 = vsel %vm269_vm5, %v268_v52, %v266_v53  ;;  %v777_v60 = vpack.c.bf16 %v361_v55, %v359_v54  ;;  %v779_v61 = vpack.c.bf16 %v360_v57, %v358_v56 }
  0xbf   : > { %v280_v3 = vmul.f32 %v1173_v50, %v270_v58  ;;  %v281_v6 = vmul.f32 %v1176_v51, %v271_v59 }
  0xc0   : > { %778 = vmatprep.subr.bf16.mxu0 %v777_v60 }
  0xc1   : > { %v302_v7 = vpop.permute.xlu1 %301  ;;  %v300_v8 = vpop.permute.xlu0 %299  ;;  %780 = vmatpush1.bf16.msra.mxu0 %v779_v61  ;;  %v347_v18 = vrot.slane %v280_v3, 4  ;;  %v348_v19 = vrot.slane %v281_v6, 4 }
  0xc2   : > { %v304_v11 = vsel %vm303_vm6, %v300_v8, %v302_v7  ;;  %v305_v12 = vsel %vm303_vm6, %v302_v7, %v300_v8 }
  0xc3   : > { %v314_v13 = vmul.f32 %v1188_v62, %v304_v11  ;;  %v315_v4 = vmul.f32 %v1191_v63, %v305_v12  ;;  %v363_v36 = vsel %vm357_vm4, %v1075_v1, %v348_v19  ;;  %v362_v38 = vsel %vm357_vm4, %v1067_v0, %v347_v18 }
  0xc5   : > { %v285_v22 = vpop.permute.xlu1 %284  ;;  %v283_v25 = vpop.permute.xlu0 %282  ;;  %v353_v28 = vrot.slane %v314_v13, 4  ;;  %v354_v29 = vrot.slane %v315_v4, 4 }
  0xc6   : > { %v287_v26 = vsel %vm286_vm7, %v283_v25, %v285_v22  ;;  %v288_v27 = vsel %vm286_vm7, %v285_v22, %v283_v25 }
  0xc7   : > { %v297_v9 = vmul.f32 %v1204_v14, %v287_v26  ;;  %v298_v30 = vmul.f32 %v1207_v17, %v288_v27 }
  0xc9   : > { %v319_v34 = vpop.permute.xlu1 %318  ;;  %v317_v35 = vpop.permute.xlu0 %316  ;;  %v365_v37 = vsel %vm357_vm4, %v298_v30, %v354_v29  ;;  %v364_v39 = vsel %vm357_vm4, %v297_v9, %v353_v28 }
  0xca   : > { %v321_v40 = vsel %vm320_vm8, %v317_v35, %v319_v34  ;;  %v322_v41 = vsel %vm320_vm8, %v319_v34, %v317_v35  ;;  %v781_v42 = vpack.c.bf16 %v365_v37, %v363_v36  ;;  %v783_v43 = vpack.c.bf16 %v364_v39, %v362_v38 }
  0xcb   : > { %v331_v44 = vmul.f32 %v1216_v10, %v321_v40  ;;  %v332_v45 = vmul.f32 %v1218_v31, %v322_v41 }
  0xcc   : > { %782 = vmatprep.subr.bf16.mxu0 %v781_v42 }
  0xcd   : > { %784 = vmatpush1.bf16.msra.mxu0 %v783_v43  ;;  %v367_v1 = vsel %vm357_vm4, %v332_v45, 1.0  ;;  %v366_v0 = vsel %vm357_vm4, %v331_v44, 1.0 }
  0xce   : > { %764 = vmatprep.subr.msk.mxu0 %vm373_vm9, %v367_v1 }
  0xd1   : > { %765 = vmatpush1.msk.msra.mxu0 %vm373_vm9, %v366_v0 }
  0xd2   : > { %766 = vmatmul.mubr.msk.f32.vlgmr.msra.gmra.mrb[0].mxu0 %vm369_vm10, %v368_v46 }
 0x1a5   : > { %v1237_v47 = vpop.f32.mrb[0].mxu0 }
 0x1a6   : > { %459 = vrot.lane.b32.xlu0 %v1237_v47, %s951_s24  ;;  %v1241_v48 = vpop.f32.mrb[1].mxu0 }
 0x1a7   : > { %461 = vrot.lane.b32.xlu1 %v1241_v48, %s951_s24  ;;  %s1350_s24 = scalar_lea.hbm %s1396_s3, %s776_s20 }
 0x1aa   : > { %483 = vrot.lane.b32.xlu0 %v1237_v47, %s954_s4 }
 0x1ab   : > { %485 = vrot.lane.b32.xlu1 %v1241_v48, %s954_s4 }
 0x1ae   : > { %467 = vrot.lane.b32.xlu0 %v1237_v47, %s953_s30 }
 0x1af   : > { %469 = vrot.lane.b32.xlu1 %v1241_v48, %s953_s30  ;;  %s959_s30 = smov [#allocation5]  }
 0x1b0   : > { %s883_s4 = sshll.u32 %s959_s30, 4  ;;  %s884_s4 = int_to_ptr.vmem [resolvable:$false] %s883_s4 }
 0x1b1   : > { %p886_p2 = scmp.lt.s32.totalorder %s1352_s27, %s884_s4 }
 0x1b2   : > { %491 = vrot.lane.b32.xlu0 %v1237_v47, %s957_s6 }
 0x1b3   : > { %493 = vrot.lane.b32.xlu1 %v1241_v48, %s957_s6 }
 0x1b6   : > { %451 = vrot.lane.b32.xlu0 %v1237_v47, %s952_s29 }
 0x1b7   : > { %453 = vrot.lane.b32.xlu1 %v1241_v48, %s952_s29  ;;  %s879_s29 = scalar_lea.vmem %s1352_s27, 256 }
 0x1b8   : > { %p880_p6 = scmp.ne.s32.totalorder %s1352_s27, %s879_s29 }
 0x1ba   : > { %475 = vrot.lane.b32.xlu0 %v1237_v47, %s950_s26  ;;  %p881_p10 = pnand %p880_p6, %p1407_p9 }
 0x1bb   : > { %477 = vrot.lane.b32.xlu1 %v1241_v48, %s950_s26 }
 0x1bc   : > { %p882_p12 = pneg %p881_p10 }
 0x1be   : > { %499 = vrot.lane.b32.xlu0 %v1237_v47, %s955_s5 }
 0x1bf   : > { %501 = vrot.lane.b32.xlu1 %v1241_v48, %s955_s5  ;;  %s885_s5 = scalar_lea.vmem %s884_s4, 512 }
 0x1c0   : > { %p887_p3 = scmp.lt.s32.totalorder %s885_s5, %s879_s29 }
 0x1c2   : > { %507 = vrot.lane.b32.xlu0 %v1237_v47, %s958_s7  ;;  %p888_p4 = por %p887_p3, %p886_p2 }
 0x1c3   : > { %509 = vrot.lane.b32.xlu1 %v1241_v48, %s958_s7 }
 0x1c4   : > { %p889_p7 = pnand %p888_p4, %p882_p12 }
 0x218   : > { %v460_v49 = vpop.permute.xlu0 %459 }
 0x219   : > { %v462_v52 = vpop.permute.xlu1 %461 }
 0x21a   : > { %v464_v59 = vsel %vm218_vm1, %v462_v52, %v460_v49  ;;  %v463_v61 = vsel %vm218_vm1, %v460_v49, %v462_v52 }
 0x21b   : > { %v465_v3 = vmul.f32 %v464_v59, %v1130_v20  ;;  %v466_v12 = vmul.f32 %v463_v61, %v1133_v21 }
 0x21c   : > { %v484_v53 = vpop.permute.xlu0 %483 }
 0x21d   : > { %v486_v54 = vpop.permute.xlu1 %485  ;;  %v517_v9 = vrot.slane %v465_v3, 6  ;;  %v518_v30 = vrot.slane %v466_v12, 6 }
 0x21e   : > { %v488_v60 = vsel %vm269_vm5, %v486_v54, %v484_v53  ;;  %v487_v6 = vsel %vm269_vm5, %v484_v53, %v486_v54 }
 0x21f   : > { %v490_v7 = vmul.f32 %v488_v60, %v1176_v51  ;;  %v489_v18 = vmul.f32 %v487_v6, %v1173_v50 }
 0x220   : > { %v468_v55 = vpop.permute.xlu0 %467 }
 0x221   : > { %v470_v56 = vpop.permute.xlu1 %469  ;;  %v536_v25 = vrot.slane %v490_v7, 6 }
 0x222   : > { %v471_v51 = vsel %vm235_vm3, %v468_v55, %v470_v56  ;;  %v472_v19 = vsel %vm235_vm3, %v470_v56, %v468_v55 }
 0x223   : > { %v473_v35 = vmul.f32 %v472_v19, %v1152_v32  ;;  %v560_v41 = vsel %vm551_vm11, %v1241_v48, %v536_v25 }
 0x224   : > { %v492_v57 = vpop.permute.xlu0 %491 }
 0x225   : > { %v494_v58 = vpop.permute.xlu1 %493 }
 0x226   : > { %v496_v8 = vsel %vm286_vm7, %v494_v58, %v492_v57  ;;  %v495_v13 = vsel %vm286_vm7, %v492_v57, %v494_v58 }
 0x227   : > { %v498_v21 = vmul.f32 %v496_v8, %v1207_v17  ;;  %v497_v26 = vmul.f32 %v495_v13, %v1204_v14  ;;  %v474_v17 = vmul.f32 %v471_v51, %v1155_v33  ;;  %v523_v33 = vrot.slane %v473_v35, 4 }
 0x228   : > { %v452_v2 = vpop.permute.xlu0 %451 }
 0x229   : > { %v454_v11 = vpop.permute.xlu1 %453  ;;  %v542_v37 = vrot.slane %v498_v21, 4  ;;  %v541_v38 = vrot.slane %v497_v26, 4  ;;  %v524_v44 = vrot.slane %v474_v17, 4 }
 0x22a   : > { %v455_v4 = vsel %vm201_vm2, %v452_v2, %v454_v11  ;;  %v456_v20 = vsel %vm201_vm2, %v454_v11, %v452_v2 }
 0x22b   : > { %v457_v27 = vmul.f32 %v456_v20, %v1137_v23  ;;  %v458_v28 = vmul.f32 %v455_v4, %v1140_v24  ;;  %v535_v23 = vrot.slane %v489_v18, 6  ;;  %v562_v46 = vsel %vm357_vm4, %v560_v41, %v542_v37 }
 0x22c   : > { %v476_v22 = vpop.permute.xlu0 %475  ;;  %v654_v4 = vrot.slane %v1241_v48, 2 }
 0x22d   : > { %v478_v29 = vpop.permute.xlu1 %477  ;;  %v553_v40 = vsel %vm551_vm11, %v458_v28, %v518_v30  ;;  %v552_v42 = vsel %vm551_vm11, %v457_v27, %v517_v9  ;;  %v559_v49 = vsel %vm551_vm11, %v1237_v47, %v535_v23 }
 0x22e   : > { %v479_v50 = vsel %vm252_vm0, %v476_v22, %v478_v29  ;;  %v480_v34 = vsel %vm252_vm0, %v478_v29, %v476_v22  ;;  %v555_v55 = vsel %vm357_vm4, %v553_v40, %v524_v44  ;;  %v554_v56 = vsel %vm357_vm4, %v552_v42, %v523_v33 }
 0x22f   : > { %v481_v36 = vmul.f32 %v480_v34, %v1118_v15  ;;  %v482_v14 = vmul.f32 %v479_v50, %v1121_v16  ;;  %v561_v58 = vsel %vm357_vm4, %v559_v49, %v541_v38 }
 0x230   : > { %v500_v24 = vpop.permute.xlu0 %499 }
 0x231   : > { %v502_v39 = vpop.permute.xlu1 %501  ;;  %v529_v32 = vrot.slane %v481_v36, 2  ;;  %v530_v43 = vrot.slane %v482_v14, 2 }
 0x232   : > { %v503_v15 = vsel %vm303_vm6, %v500_v24, %v502_v39  ;;  %v504_v16 = vsel %vm303_vm6, %v502_v39, %v500_v24 }
 0x233   : > { %v505_v45 = vmul.f32 %v503_v15, %v1188_v62  ;;  %v506_v1 = vmul.f32 %v504_v16, %v1191_v63  ;;  %v558_v62 = vsel %vm556_vm12, %v555_v55, %v530_v43  ;;  %v557_v63 = vsel %vm556_vm12, %v554_v56, %v529_v32 }
 0x234   : > { %v508_v0 = vpop.permute.xlu0 %507 }
 0x235   : > { %v547_v52 = vrot.slane %v505_v45, 2  ;;  %v548_v53 = vrot.slane %v506_v1, 2  ;;  %v510_v54 = vpop.permute.xlu1 %509 }
 0x236   : > { %v512_v57 = vsel %vm320_vm8, %v510_v54, %v508_v0  ;;  %v511_v59 = vsel %vm320_vm8, %v508_v0, %v510_v54 }
 0x237   : > { %v514_v60 = vmul.f32 %v1218_v31, %v512_v57  ;;  %v564_v61 = vsel %vm556_vm12, %v562_v46, %v548_v53  ;;  %v563_v2 = vsel %vm556_vm12, %v561_v58, %v547_v52  ;;  %v513_v7 = vmul.f32 %v1216_v10, %v511_v59 }
 0x238   : > { %v785_v3 = vpack.c.bf16 %v564_v61, %v558_v62  ;;  %v787_v6 = vpack.c.bf16 %v563_v2, %v557_v63  ;;  %v653_v10 = vrot.slane %v1237_v47, 2 }
 0x239   : > { %v566_v8 = vsel %vm551_vm11, %v514_v60, 1.0  ;;  %v565_v31 = vsel %vm551_vm11, %v513_v7, 1.0 }
 0x23a   : > { %786 = vmatprep.subr.bf16.mxu1 %v785_v3 }
 0x23b   : > { %788 = vmatpush1.bf16.msra.mxu1 %v787_v6 }
 0x23c   : > { %768 = vmatprep.subr.msk.mxu1 %vm573_vm13, %v566_v8 }
 0x23f   : > { %769 = vmatpush1.msk.msra.mxu1 %vm573_vm13, %v565_v31 }
 0x240   : > { %770 = vmatmul.mubr.msk.f32.vlgmr.msra.gmra.mrb[0].mxu1 %vm569_vm14, %v767_v5 }
 0x313   : > { %v646_v11 = vpop.f32.mrb[0].mxu1 }
 0x314   : > { %v659_v12 = vrot.slane %v646_v11, 5  ;;  %v648_v13 = vpop.f32.mrb[1].mxu1 }
 0x315   : > { %v660_v20 = vrot.slane %v648_v13, 5 }
 0x316   : > { %v663_v18 = vsel %vm573_vm13, %v653_v10, %v659_v12 }
 0x317   : > { %665 = vst [vmem:[%s179_s25] sm:$0x3f] %v663_v18  ;;  %v664_v47 = vsel %vm573_vm13, %v654_v4, %v660_v20 }
 0x318   : > { %666 = vst [vmem:[%s179_s25 + $0x8] sm:$0x3f] %v664_v47 }
 0x319   : > { %892 = shalt.err (!%p889_p7)
}
 0x31a   : > { %s893_s6 = scalar_lea.hbm %s1350_s24, 256  ;;  %s897_s9 = scalar_lea.hbm %s1396_s3, 512 }
 0x31b   : > { %p894_p8 = scmp.ne.s32.totalorder %s1350_s24, %s893_s6  ;;  %p898_p1 = scmp.lt.u32.totalorder %s1350_s24, %s1396_s3 }
 0x31c   : > { %p899_p0 = scmp.lt.u32.totalorder %s897_s9, %s893_s6  ;;  %p901_p6 = scmp.lt.u32.totalorder %s893_s6, %s1350_s24 }
 0x31d   : > { %p895_p11 = pnand %p894_p8, %p1407_p9 }
 0x31e   : > { %p900_p5 = por %p899_p0, %p898_p1 }
 0x31f   : > { %p896_p13 = pneg %p895_p11 }
 0x320   : > { %p902_p10 = por %p901_p6, %p900_p5 }
 0x322   : > { %p903_p12 = pnand %p902_p10, %p896_p13 }
 0x324   : > { %906 = shalt.err (!%p903_p12)
}
 0x325   : > { %793 = dma.vmem_to_hbm [thread:$0]  (%p1407_p9), %s1352_s27, 256, %s1350_s24, %s668_s16  }
 0x326 PF: > { %p805_p2 = scmp.ge.s32.totalorder %s945_s15, 2  ;;  %s694_s17 = sand.u32 1, %s933_s12  }
 0x327   : > { %p1408_p3 = scmp.ne.s32.totalorder %s1401_s23, 0  ;;  %s695_s19 = scalar_lea.sflag [#allocation4], %s694_s17 }
 0x329   : > { %p800_p4 = pnand %p805_p2, %p1408_p3 }
 0x32b   : > { %928 = dma.done.wait (!%p800_p4), %s695_s19, 256  }
 0x32c   : > { %930 = vsyncadd (!%p800_p4), %s695_s19, 4294967040  ;;  %p14_p7 = scmp.ge.s32.totalorder %s1005_s18, 4   ;;  %s1409_s12 = smov %s937_s13 }
 0x32d   : > { %s1410_s13 = smov %s941_s14  ;;  %s1411_s14 = smov %s1016_s21 }
 0x32e   : > { %s1412_s15 = smov %s1005_s18  ;;  %16 = sbr.rel (!%p14_p7) target bundleno = 4 (0x4), region = 73 }
 0x335   :  { %700 = vsyncpa [#allocation3], 1 }
 0x336   :  { %702 = vsyncpa [#allocation3 + $0x1], 1 }
 0x337   :  { %703 = vsyncpa [#allocation4], 1 }
 0x338   :  { %705 = vsyncpa [#allocation4 + $0x1], 1 }

</bundles_post_ra>
